<compile_context>
chip_gen: v6e
topology: v6e:2x2x1
jax: 0.10.0
libtpu: 0.0.40
codegen_flags: <defaults>
</compile_context>

<pallas_src>
import jax
import jax.numpy as jnp
from jax.experimental import pallas as pl
from jax.experimental.pallas import tpu as pltpu

THRESHOLD = 0.001


def _awl_kernel(p_ref, l_ref, out_ref):
    # p_ref: (1, num) params in VMEM (native dtype).
    # l_ref: (1, num) losses in VMEM (native dtype).
    # out_ref: (1, 1) f32 scalar loss_sum in SMEM.
    p = p_ref[...].astype(jnp.float32)        # upcast inside the kernel
    losses = l_ref[...].astype(jnp.float32)

    # normalize_params(): p /= max(p); p[p < thr] = thr
    max_val = jnp.max(p, axis=-1, keepdims=True)           # (1, 1)
    p = p * pl.reciprocal(max_val)                          # exact reciprocal-multiply
    p = jnp.maximum(p, jnp.float32(THRESHOLD))              # single vmax

    # forward(): sum_i 0.5 / p_i^2 * loss_i + log(1 + p_i^2)
    p2 = p * p
    terms = 0.5 * losses * pl.reciprocal(p2) + jnp.log(1.0 + p2)
    out_ref[0, 0] = jnp.sum(terms)


def automatic_weighted_loss(params, losses):
    """params: (num,) array, losses: (num,) array -> scalar f32 loss_sum."""
    num = params.shape[0]
    # Reshape to lane-dense (1, num) -- metadata-only, no extra compute op.
    p2d = params.reshape(1, num)
    l2d = losses.reshape(1, num)

    out = pl.pallas_call(
        _awl_kernel,
        out_shape=jax.ShapeDtypeStruct((1, 1), jnp.float32),
        in_specs=[
            pl.BlockSpec(memory_space=pltpu.MemorySpace.VMEM),
            pl.BlockSpec(memory_space=pltpu.MemorySpace.VMEM),
        ],
        out_specs=pl.BlockSpec(memory_space=pltpu.MemorySpace.SMEM),
    )(p2d, l2d)
    return out[0, 0]


def reference(params, losses):
    p = params.astype(jnp.float32)
    l = losses.astype(jnp.float32)
    p = p / jnp.max(p)
    p = jnp.where(p < THRESHOLD, THRESHOLD, p)
    p2 = p * p
    return jnp.sum(0.5 / p2 * l + jnp.log(1.0 + p2))


if __name__ == "__main__":
    num = 3
    # Deterministic init, matching nn.Parameter(torch.ones(num)).
    params = jnp.ones((num,), dtype=jnp.float32)

    # Example multi-task losses (scalars), deterministic.
    key = jax.random.PRNGKey(0)
    losses = jax.random.uniform(key, (num,), dtype=jnp.float32, minval=0.5, maxval=3.0)

    out = automatic_weighted_loss(params, losses)
    jax.block_until_ready(out)

    ref = reference(params, losses)
    assert jnp.allclose(out, ref, rtol=1e-5, atol=1e-5), (out, ref)
    print("KERNEL_OK")
</pallas_src>

<mosaic_0001>
module attributes {stable_mosaic.version = 11 : i64} {
  func.func @_awl_kernel(%arg0: memref<1x3xf32, #tpu.memory_space<vmem>>, %arg1: memref<1x3xf32, #tpu.memory_space<vmem>>, %arg2: memref<1x1xf32, #tpu.memory_space<smem>>) attributes {dimension_semantics = [], scalar_prefetch = 0 : i64, scratch_operands = 0 : i64, tpu.core_type = #tpu.core_type<tc>} {
    %c0 = arith.constant 0 : index
    %c0_0 = arith.constant 0 : index
    %0 = vector.load %arg0[%c0, %c0_0] : memref<1x3xf32, #tpu.memory_space<vmem>>, vector<1x3xf32>
    %c0_1 = arith.constant 0 : index
    %c0_2 = arith.constant 0 : index
    %1 = vector.load %arg1[%c0_1, %c0_2] : memref<1x3xf32, #tpu.memory_space<vmem>>, vector<1x3xf32>
    %cst = arith.constant dense<0xFF800000> : vector<1xf32>
    %2 = vector.multi_reduction <maximumf>, %0, %cst [1] : vector<1x3xf32> to vector<1xf32>
    %3 = vector.shape_cast %2 : vector<1xf32> to vector<1x1xf32>
    %4 = tpu.reciprocal %3 : vector<1x1xf32> -> vector<1x1xf32>
    %5 = vector.broadcast %4 : vector<1x1xf32> to vector<1x3xf32>
    %6 = arith.mulf %0, %5 : vector<1x3xf32>
    %cst_3 = arith.constant 1.000000e-03 : f32
    %7 = vector.broadcast %cst_3 : f32 to vector<1x3xf32>
    %8 = arith.maximumf %6, %7 : vector<1x3xf32>
    %9 = arith.mulf %8, %8 : vector<1x3xf32>
    %cst_4 = arith.constant 5.000000e-01 : f32
    %10 = vector.broadcast %cst_4 : f32 to vector<1x3xf32>
    %11 = arith.mulf %10, %1 : vector<1x3xf32>
    %12 = tpu.reciprocal %9 : vector<1x3xf32> -> vector<1x3xf32>
    %13 = arith.mulf %11, %12 : vector<1x3xf32>
    %cst_5 = arith.constant 1.000000e+00 : f32
    %14 = vector.broadcast %cst_5 : f32 to vector<1x3xf32>
    %15 = arith.addf %14, %9 : vector<1x3xf32>
    %16 = math.log %15 : vector<1x3xf32>
    %17 = arith.addf %13, %16 : vector<1x3xf32>
    %18 = vector.shape_cast %17 : vector<1x3xf32> to vector<1x1x3xf32>
    %cst_6 = arith.constant dense<0.000000e+00> : vector<1xf32>
    %19 = vector.multi_reduction <add>, %18, %cst_6 [1, 2] : vector<1x1x3xf32> to vector<1xf32>
    %20 = vector.shape_cast %19 : vector<1xf32> to vector<1x1x1xf32>
    %21 = vector.extract %20[0, 0, 0] : f32 from vector<1x1x1xf32>
    %c0_7 = arith.constant 0 : index
    %c0_8 = arith.constant 0 : index
    %22 = memref.load %arg2[%c0_7, %c0_8] : memref<1x1xf32, #tpu.memory_space<smem>>
    memref.store %21, %arg2[%c0_7, %c0_8] : memref<1x1xf32, #tpu.memory_space<smem>>
    return
  }
}

</mosaic_0001>

<bundles_post_ra>
// kernel: tpu_custom_call.1
= control target key start
LH: loop header
LB: loop body
LE: loop exit
PB: predicated region body
PF: predicated region fallthrough
CT: control target
= control target key end

     0   :  { %7 = vsyncpa [#allocation3], 0  ;;  %s137_s0 = inlined_call_operand.hbm [shape: f32[1,3], index: 0, kind: input, shape index: {}]   ;;  %s138_s1 = inlined_call_operand.vmem [shape: f32[1,3], index: 1, kind: input, shape index: {}]   ;;  %s139_s2 = inlined_call_operand.hbm [shape: f32[1,1], index: 2, kind: output, shape index: {}]  }
   0x1   :  { %8 = vsyncpa [#allocation4], 0  ;;  %s109_s9 = smov [#allocation2]  }
   0x2   :  { %s15_s10 = sshll.u32 %s109_s9, 4  ;;  %s16_s10 = int_to_ptr.vmem [resolvable:$true] %s15_s10 }
   0x3   :  { %s85_s11 = scalar_lea.vmem %s16_s10, 16  ;;  %s89_s12 = scalar_lea.vmem %s16_s10, 32 }
   0x4   :  { %p86_p0 = scmp.ne.s32.totalorder %s16_s10, %s85_s11  ;;  %p90_p1 = scmp.lt.s32.totalorder %s16_s10, %s16_s10 }
   0x5   :  { %p91_p2 = scmp.lt.s32.totalorder %s89_s12, %s85_s11 }
   0x7   :  { %p92_p3 = por %p91_p2, %p90_p1 }
   0x9   :  { %p93_p4 = pnand %p92_p3, %p86_p0 }
   0xb   :  { %96 = shalt.err (!%p93_p4)
}
   0xc   :  { %18 = dma.hbm_to_vmem [thread:$0]  %s137_s0, 16, %s16_s10, [#allocation3]  }
   0xd   :  { %105 = dma.done.wait [#allocation3], 16  }
   0xe   :  { %106 = vsyncadd [#allocation3], 4294967280  ;;  %vm26_vm0 = vcmask 16384   ;;  %v24_v0 = vld [vmem:[#allocation2] sm:$0x1] }
   0xf   :  { %v27_v1 = vsel %vm26_vm0, %v24_v0, -inf  ;;  %v25_v8 = vld [vmem:[%s138_s1] sm:$0x1]  ;;  %s110_s1 = smov [#allocation5]  }
  0x10   :  { %28 = vmax.xlane.f32.xlu0 %v27_v1  ;;  %v34_v9 = vmul.f32 0.5, %v25_v8 }
  0x99   :  { %v29_v2 = vpop.xlane.xlu0 %28 }
  0x9a   :  { %71 = vrcp.f32 %v29_v2 }
  0xa7   :  { %v72_v3 = vpop.eup %71 }
  0xa8   :  { %v31_v4 = vmul.f32 %v72_v3, %v24_v0 }
  0xaa   :  { %v32_v5 = vmax.f32 %v31_v4, 0.001 }
  0xac   :  { %v33_v6 = vmul.f32 %v32_v5, %v32_v5 }
  0xae   :  { %73 = vrcp.f32 %v33_v6  ;;  %v37_v7 = vadd.f32 1.0, %v33_v6 }
  0xb0   :  { %75 = vlog2.f32 %v37_v7 }
  0xbb   :  { %v74_v10 = vpop.eup %73 }
  0xbc   :  { %v36_v12 = vmul.f32 %v74_v10, %v34_v9 }
  0xbd   :  { %v76_v11 = vpop.eup %75 }
  0xbe   :  { %v39_v13 = vmul.f32 0.6931472, %v76_v11 }
  0xc0   :  { %v40_v14 = vadd.f32 %v39_v13, %v36_v12 }
  0xc2   :  { %v41_v15 = vsel %vm26_vm0, %v40_v14, 0.0 }
  0xc3   :  { %42 = vadd.xlane.f32.xlu0 %v41_v15 }
 0x14c   :  { %v43_v16 = vpop.xlane.xlu0 %42 }
 0x14d   :  { %v44_v17 = vrot.slane %v43_v16, 4 }
 0x14f   :  { %v45_v18 = vadd.f32 %v44_v17, %v43_v16 }
 0x151   :  { %v46_v19 = vrot.slane %v45_v18, 2 }
 0x153   :  { %v47_v20 = vadd.f32 %v46_v19, %v45_v18 }
 0x155   :  { %v48_v21 = vrot.slane %v47_v20, 1 }
 0x157   :  { %v49_v22 = vadd.f32 %v48_v21, %v47_v20 }
 0x159   :  { %67 = vpush %v49_v22 }
 0x18a   :  { %s68_s0 = spop %67 }
 0x18b   :  { %52 = sst [smem:[#allocation5]] %s68_s0 }
 0x18c   :  { %60 = dma.smem_to_hbm %s110_s1, 16, %s139_s2, [#allocation4]  }
 0x18d   :  { %107 = dma.done.wait [#allocation4], 16  }
 0x18e   :  { %108 = vsyncadd [#allocation4], 4294967280 }
 0x18f   :  { %64 = sfence }
 0x190   :  { %65 = vsyncpa [#allocation3], 1 }
 0x191   :  { %66 = vsyncpa [#allocation4], 1 }

</bundles_post_ra>
